<compile_context>
chip_gen: v5e
topology: v5e:2x2
jax: 0.10.0
libtpu: 0.0.40
codegen_flags: <defaults>
</compile_context>

<pallas_src>
import functools

import jax
import jax.numpy as jnp
from jax.experimental import pallas as pl
from jax.experimental.pallas import tpu as pltpu


def _round_up(x, m):
    return ((x + m - 1) // m) * m


def _make_chamfer_kernel(ng, np_, ng_t, np_t, mask_rows, mask_cols):
    """Kernel over grid (B, ni, nj): i tiles Ng (rows of P), j tiles Np (cols of P)."""

    def kernel(x_ref, y_ref, out_ref, rowmin_ref, colmin_ref):
        i = pl.program_id(1)
        j = pl.program_id(2)
        ni = pl.num_programs(1)
        nj = pl.num_programs(2)

        # Per-batch init: zero the loss accumulator, reset the column-min scratch.
        @pl.when(jnp.logical_and(i == 0, j == 0))
        def _():
            out_ref[...] = jnp.zeros_like(out_ref)
            colmin_ref[...] = jnp.full(colmin_ref.shape, jnp.inf,
                                       dtype=colmin_ref.dtype)

        # Per-row-tile init: reset the row-min scratch.
        @pl.when(j == 0)
        def _():
            rowmin_ref[...] = jnp.full(rowmin_ref.shape, jnp.inf,
                                       dtype=rowmin_ref.dtype)

        x = x_ref[0]   # (ng_t, k_pad)  augmented gts rows
        y = y_ref[0]   # (k_pad, np_t)  augmented, transposed preds

        # Pairwise squared distances for this tile, entirely on the MXU:
        # P[i,j] = xx_i + yy_j - 2 * <x_i, y_j>
        p = jnp.dot(x, y, preferred_element_type=jnp.float32)   # (ng_t, np_t)

        if mask_rows:
            row_valid = (jax.lax.broadcasted_iota(jnp.int32, (ng_t, 1), 0)
                         + i * ng_t) < ng                        # (ng_t, 1)
        if mask_cols:
            col_valid = (jax.lax.broadcasted_iota(jnp.int32, (1, np_t), 1)
                         + j * np_t) < np_                       # (1, np_t)

        # ---- min over preds (columns) for each gts row: running min across j ----
        p_row = jnp.where(col_valid, p, jnp.inf) if mask_cols else p
        tile_row_min = jnp.min(p_row, axis=1, keepdims=True)     # (ng_t, 1)
        rowmin_ref[...] = jnp.minimum(rowmin_ref[...], tile_row_min)

        # ---- min over gts (rows) for each preds column: running min across i ----
        p_col = jnp.where(row_valid, p, jnp.inf) if mask_rows else p
        tile_col_min = jnp.min(p_col, axis=0, keepdims=True)     # (1, np_t)
        colmin_ref[j] = jnp.minimum(colmin_ref[j], tile_col_min)

        # Epilogue 1: finished all column tiles for this row tile -> add row-min sum.
        @pl.when(j == nj - 1)
        def _():
            rm = rowmin_ref[...]
            if mask_rows:
                rm = jnp.where(row_valid, rm, 0.0)
            out_ref[...] = out_ref[...] + jnp.sum(rm)

        # Epilogue 2: finished the whole batch element -> add column-min sum.
        @pl.when(jnp.logical_and(i == ni - 1, j == nj - 1))
        def _():
            cm = colmin_ref[...]                                 # (nj, 1, np_t)
            if mask_cols:
                gcol = (jax.lax.broadcasted_iota(jnp.int32, cm.shape, 0) * np_t
                        + jax.lax.broadcasted_iota(jnp.int32, cm.shape, 2))
                cm = jnp.where(gcol < np_, cm, 0.0)
            out_ref[...] = out_ref[...] + jnp.sum(cm)

    return kernel


def chamfer_loss(preds, gts, *, ng_tile=512, np_tile=1024):
    """preds: (B, Np, D), gts: (B, Ng, D) -> scalar float32 Chamfer loss."""
    B, Np, D = preds.shape
    Bg, Ng, Dg = gts.shape
    assert B == Bg and D == Dg

    k = D + 2                      # [coords, 1, squared-norm]
    k_pad = _round_up(k, 8)

    ng_t = min(_round_up(ng_tile, 8), _round_up(Ng, 8))
    np_t = min(_round_up(np_tile, 128), _round_up(Np, 128))
    ng_pad = _round_up(Ng, ng_t)
    np_pad = _round_up(Np, np_t)
    ni = ng_pad // ng_t
    nj = np_pad // np_t
    mask_rows = ng_pad != Ng
    mask_cols = np_pad != Np

    x = gts.astype(jnp.float32)        # (B, Ng, D)
    y = preds.astype(jnp.float32)      # (B, Np, D)
    xx = jnp.sum(x * x, axis=-1, keepdims=True)    # (B, Ng, 1)
    yy = jnp.sum(y * y, axis=-1)                   # (B, Np)

    # Augmented LHS:  X' = [x, 1, xx, 0...]  -> (B, Ng_pad, k_pad)
    x_aug = jnp.concatenate(
        [x,
         jnp.ones((B, Ng, 1), jnp.float32),
         xx,
         jnp.zeros((B, Ng, k_pad - k), jnp.float32)], axis=-1)
    x_aug = jnp.pad(x_aug, ((0, 0), (0, ng_pad - Ng), (0, 0)))

    # Augmented, transposed RHS:  Y'^T = [-2*y^T; yy; 1; 0...] -> (B, k_pad, Np_pad)
    yT = jnp.swapaxes(y, 1, 2)                     # (B, D, Np)
    y_aug = jnp.concatenate(
        [-2.0 * yT,
         yy[:, None, :],
         jnp.ones((B, 1, Np), jnp.float32),
         jnp.zeros((B, k_pad - k, Np), jnp.float32)], axis=1)
    y_aug = jnp.pad(y_aug, ((0, 0), (0, 0), (0, np_pad - Np)))

    kernel = _make_chamfer_kernel(Ng, Np, ng_t, np_t, mask_rows, mask_cols)

    partials = pl.pallas_call(
        kernel,
        out_shape=jax.ShapeDtypeStruct((B, 1, 1), jnp.float32),
        grid_spec=pltpu.PrefetchScalarGridSpec(
            num_scalar_prefetch=0,
            grid=(B, ni, nj),
            in_specs=[
                pl.BlockSpec((1, ng_t, k_pad), lambda b, i, j: (b, i, 0)),
                pl.BlockSpec((1, k_pad, np_t), lambda b, i, j: (b, 0, j)),
            ],
            out_specs=pl.BlockSpec((1, 1, 1), lambda b, i, j: (b, 0, 0)),
            scratch_shapes=[
                pltpu.VMEM((ng_t, 1), jnp.float32),      # running min over columns
                pltpu.VMEM((nj, 1, np_t), jnp.float32),  # running min over rows
            ],
        ),
        compiler_params=pltpu.CompilerParams(
            dimension_semantics=("parallel", "arbitrary", "arbitrary"),
        ),
    )(x_aug, y_aug)

    return jnp.sum(partials)


def chamfer_loss_ref(preds, gts):
    """Pure-JAX reference mirroring the PyTorch forward."""
    x = gts.astype(jnp.float32)
    y = preds.astype(jnp.float32)
    xx = jnp.sum(x * x, axis=-1)                       # (B, Ng)
    yy = jnp.sum(y * y, axis=-1)                       # (B, Np)
    zz = jnp.einsum("bnd,bmd->bnm", x, y)              # (B, Ng, Np)
    P = xx[:, :, None] + yy[:, None, :] - 2.0 * zz
    loss_1 = jnp.sum(jnp.min(P, axis=1))
    loss_2 = jnp.sum(jnp.min(P, axis=2))
    return loss_1 + loss_2


def _check(preds, gts, **kw):
    out = jax.block_until_ready(chamfer_loss(preds, gts, **kw))
    ref = chamfer_loss_ref(preds, gts)
    assert jnp.allclose(out, ref, rtol=1e-4, atol=1e-3), (out, ref)


if __name__ == "__main__":
    key = jax.random.PRNGKey(0)
    k1, k2, k3, k4, k5, k6 = jax.random.split(key, 6)

    # Test 1: small clouds, single tile per batch, row+column padding masks exercised.
    B, Np, Ng, D = 2, 30, 20, 3
    preds = jax.random.normal(k1, (B, Np, D), dtype=jnp.float32)
    gts = jax.random.normal(k2, (B, Ng, D), dtype=jnp.float32)
    _check(preds, gts)

    # Test 2: multiple tiles along both Ng and Np with padding/masking.
    B, Np, Ng, D = 2, 500, 300, 3
    preds = jax.random.normal(k3, (B, Np, D), dtype=jnp.float32)
    gts = jax.random.normal(k4, (B, Ng, D), dtype=jnp.float32)
    _check(preds, gts, ng_tile=128, np_tile=256)

    # Test 3: exact tile multiples (unmasked fast path), multi-tile accumulation.
    B, Np, Ng, D = 2, 256, 256, 3
    preds = jax.random.normal(k5, (B, Np, D), dtype=jnp.float32)
    gts = jax.random.normal(k6, (B, Ng, D), dtype=jnp.float32)
    _check(preds, gts, ng_tile=128, np_tile=128)

    print("KERNEL_OK")
</pallas_src>

<mosaic_0001>
module attributes {stable_mosaic.version = 11 : i64} {
  func.func @kernel(%arg0: i32, %arg1: i32, %arg2: i32, %arg3: memref<1x24x8xf32, #tpu.memory_space<vmem>>, %arg4: memref<1x8x128xf32, #tpu.memory_space<vmem>>, %arg5: memref<1x1x1xf32, #tpu.memory_space<vmem>>, %arg6: memref<24x1xf32, #tpu.memory_space<vmem>>, %arg7: memref<1x1x128xf32, #tpu.memory_space<vmem>>) attributes {dimension_semantics = [#tpu.dimension_semantics<parallel>, #tpu.dimension_semantics<arbitrary>, #tpu.dimension_semantics<arbitrary>], iteration_bounds = array<i64: 2, 1, 1>, scalar_prefetch = 0 : i64, scratch_operands = 2 : i64, tpu.core_type = #tpu.core_type<tc>, window_params = [{transform_indices = @transform_0, window_bounds = array<i64: 1, 24, 8>}, {transform_indices = @transform_1, window_bounds = array<i64: 1, 8, 128>}, {transform_indices = @transform_2, window_bounds = array<i64: 1, 1, 1>}]} {
    %c0_i32 = arith.constant 0 : i32
    %0 = arith.cmpi eq, %arg1, %c0_i32 : i32
    %c0_i32_0 = arith.constant 0 : i32
    %1 = arith.cmpi eq, %arg2, %c0_i32_0 : i32
    %2 = arith.andi %0, %1 : i1
    %3 = arith.extui %2 : i1 to i32
    %c0_i32_1 = arith.constant 0 : i32
    %4 = arith.cmpi ne, %3, %c0_i32_1 : i32
    scf.if %4 {
      %cst_26 = arith.constant 0.000000e+00 : f32
      %56 = vector.broadcast %cst_26 : f32 to vector<1x1x1xf32>
      %c0_27 = arith.constant 0 : index
      %c0_28 = arith.constant 0 : index
      %c0_29 = arith.constant 0 : index
      %57 = vector.load %arg5[%c0_27, %c0_28, %c0_29] : memref<1x1x1xf32, #tpu.memory_space<vmem>>, vector<1x1x1xf32>
      tpu.vector_store %arg5[%c0_27, %c0_28, %c0_29], %56 {strides = array<i32>} : memref<1x1x1xf32, #tpu.memory_space<vmem>>, vector<1x1x1xf32>,
      %cst_30 = arith.constant 0x7F800000 : f32
      %58 = vector.broadcast %cst_30 : f32 to vector<1x1x128xf32>
      %c0_31 = arith.constant 0 : index
      %c0_32 = arith.constant 0 : index
      %c0_33 = arith.constant 0 : index
      %59 = vector.load %arg7[%c0_31, %c0_32, %c0_33] : memref<1x1x128xf32, #tpu.memory_space<vmem>>, vector<1x1x128xf32>
      tpu.vector_store %arg7[%c0_31, %c0_32, %c0_33], %58 {strides = array<i32>} : memref<1x1x128xf32, #tpu.memory_space<vmem>>, vector<1x1x128xf32>,
    } else {
    }
    %c0_i32_2 = arith.constant 0 : i32
    %5 = arith.cmpi eq, %arg2, %c0_i32_2 : i32
    %6 = arith.extui %5 : i1 to i32
    %c0_i32_3 = arith.constant 0 : i32
    %7 = arith.cmpi ne, %6, %c0_i32_3 : i32
    scf.if %7 {
      %cst_26 = arith.constant 0x7F800000 : f32
      %56 = vector.broadcast %cst_26 : f32 to vector<24x1xf32>
      %c0_27 = arith.constant 0 : index
      %c0_28 = arith.constant 0 : index
      %57 = vector.load %arg6[%c0_27, %c0_28] : memref<24x1xf32, #tpu.memory_space<vmem>>, vector<24x1xf32>
      tpu.vector_store %arg6[%c0_27, %c0_28], %56 {strides = array<i32>} : memref<24x1xf32, #tpu.memory_space<vmem>>, vector<24x1xf32>,
    } else {
    }
    %c0 = arith.constant 0 : index
    %c0_4 = arith.constant 0 : index
    %c0_5 = arith.constant 0 : index
    %8 = vector.load %arg3[%c0, %c0_4, %c0_5] : memref<1x24x8xf32, #tpu.memory_space<vmem>>, vector<1x24x8xf32>
    %9 = vector.shape_cast %8 : vector<1x24x8xf32> to vector<24x8xf32>
    %c0_6 = arith.constant 0 : index
    %c0_7 = arith.constant 0 : index
    %c0_8 = arith.constant 0 : index
    %10 = vector.load %arg4[%c0_6, %c0_7, %c0_8] : memref<1x8x128xf32, #tpu.memory_space<vmem>>, vector<1x8x128xf32>
    %11 = vector.shape_cast %10 : vector<1x8x128xf32> to vector<8x128xf32>
    %cst = arith.constant dense<0.000000e+00> : vector<24x128xf32>
    %12 = tpu.matmul %9, %11, %cst {dimension_numbers = #tpu.dot_dimension_numbers<[1], [0], [0], [1], [0, 0, 1, 1], [], []>} : vector<24x8xf32>, vector<8x128xf32>, vector<24x128xf32> -> vector<24x128xf32>
    %13 = tpu.iota {dimensions = array<i32: 0>} : vector<24x1xi32>
    %c24_i32 = arith.constant 24 : i32
    %14 = arith.muli %arg1, %c24_i32 : i32
    %15 = vector.broadcast %14 : i32 to vector<24x1xi32>
    %16 = arith.addi %13, %15 : vector<24x1xi32>
    %c20_i32 = arith.constant 20 : i32
    %17 = vector.broadcast %c20_i32 : i32 to vector<24x1xi32>
    %18 = arith.cmpi slt, %16, %17 : vector<24x1xi32>
    %19 = tpu.iota {dimensions = array<i32: 1>} : vector<1x128xi32>
    %c128_i32 = arith.constant 128 : i32
    %20 = arith.muli %arg2, %c128_i32 : i32
    %21 = vector.broadcast %20 : i32 to vector<1x128xi32>
    %22 = arith.addi %19, %21 : vector<1x128xi32>
    %c30_i32 = arith.constant 30 : i32
    %23 = vector.broadcast %c30_i32 : i32 to vector<1x128xi32>
    %24 = arith.cmpi slt, %22, %23 : vector<1x128xi32>
    %cst_9 = arith.constant 0x7F800000 : f32
    %25 = vector.shape_cast %24 : vector<1x128xi1> to vector<1x128xi1>
    %26 = vector.broadcast %25 : vector<1x128xi1> to vector<24x128xi1>
    %27 = vector.broadcast %cst_9 : f32 to vector<24x128xf32>
    %28 = arith.select %26, %12, %27 : vector<24x128xi1>, vector<24x128xf32>
    %cst_10 = arith.constant dense<0x7F800000> : vector<24xf32>
    %29 = vector.multi_reduction <minimumf>, %28, %cst_10 [1] : vector<24x128xf32> to vector<24xf32>
    %30 = vector.shape_cast %29 : vector<24xf32> to vector<24x1xf32>
    %c0_11 = arith.constant 0 : index
    %c0_12 = arith.constant 0 : index
    %31 = vector.load %arg6[%c0_11, %c0_12] : memref<24x1xf32, #tpu.memory_space<vmem>>, vector<24x1xf32>
    %32 = arith.minimumf %31, %30 : vector<24x1xf32>
    %c0_13 = arith.constant 0 : index
    %c0_14 = arith.constant 0 : index
    %33 = vector.load %arg6[%c0_13, %c0_14] : memref<24x1xf32, #tpu.memory_space<vmem>>, vector<24x1xf32>
    tpu.vector_store %arg6[%c0_13, %c0_14], %32 {strides = array<i32>} : memref<24x1xf32, #tpu.memory_space<vmem>>, vector<24x1xf32>,
    %cst_15 = arith.constant 0x7F800000 : f32
    %34 = vector.shape_cast %18 : vector<24x1xi1> to vector<24x1xi1>
    %35 = vector.broadcast %34 : vector<24x1xi1> to vector<24x128xi1>
    %36 = vector.broadcast %cst_15 : f32 to vector<24x128xf32>
    %37 = arith.select %35, %12, %36 : vector<24x128xi1>, vector<24x128xf32>
    %cst_16 = arith.constant dense<0x7F800000> : vector<128xf32>
    %38 = vector.multi_reduction <minimumf>, %37, %cst_16 [0] : vector<24x128xf32> to vector<128xf32>
    %39 = vector.shape_cast %38 : vector<128xf32> to vector<1x128xf32>
    %40 = arith.index_cast %arg2 : i32 to index
    %c0_17 = arith.constant 0 : index
    %c0_18 = arith.constant 0 : index
    %41 = vector.load %arg7[%40, %c0_17, %c0_18] : memref<1x1x128xf32, #tpu.memory_space<vmem>>, vector<1x1x128xf32>
    %42 = vector.shape_cast %41 : vector<1x1x128xf32> to vector<1x128xf32>
    %43 = arith.minimumf %42, %39 : vector<1x128xf32>
    %44 = arith.index_cast %arg2 : i32 to index
    %c0_19 = arith.constant 0 : index
    %c0_20 = arith.constant 0 : index
    %45 = vector.load %arg7[%44, %c0_19, %c0_20] : memref<1x1x128xf32, #tpu.memory_space<vmem>>, vector<1x1x128xf32>
    %46 = vector.shape_cast %45 : vector<1x1x128xf32> to vector<1x128xf32>
    %47 = vector.shape_cast %43 : vector<1x128xf32> to vector<1x1x128xf32>
    tpu.vector_store %arg7[%44, %c0_19, %c0_20], %47 {strides = array<i32>} : memref<1x1x128xf32, #tpu.memory_space<vmem>>, vector<1x1x128xf32>,
    %c0_i32_21 = arith.constant 0 : i32
    %48 = arith.cmpi eq, %arg2, %c0_i32_21 : i32
    %49 = arith.extui %48 : i1 to i32
    %c0_i32_22 = arith.constant 0 : i32
    %50 = arith.cmpi ne, %49, %c0_i32_22 : i32
    scf.if %50 {
      %c0_26 = arith.constant 0 : index
      %c0_27 = arith.constant 0 : index
      %56 = vector.load %arg6[%c0_26, %c0_27] : memref<24x1xf32, #tpu.memory_space<vmem>>, vector<24x1xf32>
      %cst_28 = arith.constant 0.000000e+00 : f32
      %57 = vector.broadcast %cst_28 : f32 to vector<24x1xf32>
      %58 = arith.select %18, %56, %57 : vector<24x1xi1>, vector<24x1xf32>
      %c0_29 = arith.constant 0 : index
      %c0_30 = arith.constant 0 : index
      %c0_31 = arith.constant 0 : index
      %59 = vector.load %arg5[%c0_29, %c0_30, %c0_31] : memref<1x1x1xf32, #tpu.memory_space<vmem>>, vector<1x1x1xf32>
      %60 = vector.shape_cast %58 : vector<24x1xf32> to vector<1x24x1xf32>
      %cst_32 = arith.constant dense<0.000000e+00> : vector<1xf32>
      %61 = vector.multi_reduction <add>, %60, %cst_32 [1, 2] : vector<1x24x1xf32> to vector<1xf32>
      %62 = vector.shape_cast %61 : vector<1xf32> to vector<1x1x1xf32>
      %63 = vector.extract %62[0, 0, 0] : f32 from vector<1x1x1xf32>
      %64 = vector.broadcast %63 : f32 to vector<1x1x1xf32>
      %65 = arith.addf %59, %64 : vector<1x1x1xf32>
      %c0_33 = arith.constant 0 : index
      %c0_34 = arith.constant 0 : index
      %c0_35 = arith.constant 0 : index
      %66 = vector.load %arg5[%c0_33, %c0_34, %c0_35] : memref<1x1x1xf32, #tpu.memory_space<vmem>>, vector<1x1x1xf32>
      tpu.vector_store %arg5[%c0_33, %c0_34, %c0_35], %65 {strides = array<i32>} : memref<1x1x1xf32, #tpu.memory_space<vmem>>, vector<1x1x1xf32>,
    } else {
    }
    %c0_i32_23 = arith.constant 0 : i32
    %51 = arith.cmpi eq, %arg1, %c0_i32_23 : i32
    %c0_i32_24 = arith.constant 0 : i32
    %52 = arith.cmpi eq, %arg2, %c0_i32_24 : i32
    %53 = arith.andi %51, %52 : i1
    %54 = arith.extui %53 : i1 to i32
    %c0_i32_25 = arith.constant 0 : i32
    %55 = arith.cmpi ne, %54, %c0_i32_25 : i32
    scf.if %55 {
      %c0_26 = arith.constant 0 : index
      %c0_27 = arith.constant 0 : index
      %c0_28 = arith.constant 0 : index
      %56 = vector.load %arg7[%c0_26, %c0_27, %c0_28] : memref<1x1x128xf32, #tpu.memory_space<vmem>>, vector<1x1x128xf32>
      %57 = tpu.iota {dimensions = array<i32: 0>} : vector<1x1x128xi32>
      %c128_i32_29 = arith.constant 128 : i32
      %58 = vector.broadcast %c128_i32_29 : i32 to vector<1x1x128xi32>
      %59 = arith.muli %57, %58 : vector<1x1x128xi32>
      %60 = tpu.iota {dimensions = array<i32: 2>} : vector<1x1x128xi32>
      %61 = arith.addi %59, %60 : vector<1x1x128xi32>
      %c30_i32_30 = arith.constant 30 : i32
      %62 = vector.broadcast %c30_i32_30 : i32 to vector<1x1x128xi32>
      %63 = arith.cmpi slt, %61, %62 : vector<1x1x128xi32>
      %cst_31 = arith.constant 0.000000e+00 : f32
      %64 = vector.broadcast %cst_31 : f32 to vector<1x1x128xf32>
      %65 = arith.select %63, %56, %64 : vector<1x1x128xi1>, vector<1x1x128xf32>
      %c0_32 = arith.constant 0 : index
      %c0_33 = arith.constant 0 : index
      %c0_34 = arith.constant 0 : index
      %66 = vector.load %arg5[%c0_32, %c0_33, %c0_34] : memref<1x1x1xf32, #tpu.memory_space<vmem>>, vector<1x1x1xf32>
      %67 = vector.shape_cast %65 : vector<1x1x128xf32> to vector<1x1x1x128xf32>
      %cst_35 = arith.constant dense<0.000000e+00> : vector<1xf32>
      %68 = vector.multi_reduction <add>, %67, %cst_35 [1, 2, 3] : vector<1x1x1x128xf32> to vector<1xf32>
      %69 = vector.shape_cast %68 : vector<1xf32> to vector<1x1x1x1xf32>
      %70 = vector.extract %69[0, 0, 0, 0] : f32 from vector<1x1x1x1xf32>
      %71 = vector.broadcast %70 : f32 to vector<1x1x1xf32>
      %72 = arith.addf %66, %71 : vector<1x1x1xf32>
      %c0_36 = arith.constant 0 : index
      %c0_37 = arith.constant 0 : index
      %c0_38 = arith.constant 0 : index
      %73 = vector.load %arg5[%c0_36, %c0_37, %c0_38] : memref<1x1x1xf32, #tpu.memory_space<vmem>>, vector<1x1x1xf32>
      tpu.vector_store %arg5[%c0_36, %c0_37, %c0_38], %72 {strides = array<i32>} : memref<1x1x1xf32, #tpu.memory_space<vmem>>, vector<1x1x1xf32>,
    } else {
    }
    return
  }
  func.func @transform_0(%arg0: i32, %arg1: i32, %arg2: i32) -> (i32, i32, i32) {
    %c0_i32 = arith.constant 0 : i32
    %c0_i32_0 = arith.constant 0 : i32
    return %arg0, %arg1, %c0_i32 : i32, i32, i32
  }
  func.func @transform_1(%arg0: i32, %arg1: i32, %arg2: i32) -> (i32, i32, i32) {
    %c0_i32 = arith.constant 0 : i32
    %c0_i32_0 = arith.constant 0 : i32
    return %arg0, %c0_i32, %arg2 : i32, i32, i32
  }
  func.func @transform_2(%arg0: i32, %arg1: i32, %arg2: i32) -> (i32, i32, i32) {
    %c0_i32 = arith.constant 0 : i32
    %c0_i32_0 = arith.constant 0 : i32
    %c0_i32_1 = arith.constant 0 : i32
    return %arg0, %c0_i32, %c0_i32_0 : i32, i32, i32
  }
}

</mosaic_0001>

<bundles_post_ra>
// kernel: tpu_custom_call.1
= control target key start
LH: loop header
LB: loop body
LE: loop exit
PB: predicated region body
PF: predicated region fallthrough
CT: control target
= control target key end

     0   :  { %s534_s9 = smov 0   ;;  %s536_s10 = smov 0   ;;  %s593_s0 = inlined_call_operand.vmem [shape: f32[2,24,8], index: 0, kind: input, shape index: {}]   ;;  %s594_s1 = inlined_call_operand.vmem [shape: f32[2,8,128], index: 1, kind: input, shape index: {}]   ;;  %s595_s2 = inlined_call_operand.vmem [shape: f32[2,1,1], index: 2, kind: output, shape index: {}]  }
   0x1   :  { %s538_s11 = smov 0  }
   0x2 LB: > { %s31_s12 = sadd.s32 1, %s511_s10  ;;  %p452_p0 = scmp.ge.s32.totalorder %s515_s11, 1  ;;  %s515_s11 = sphi %s538_s11, %s12_s11   ;;  %s511_s10 = sphi %s536_s10, %s597_s10   ;;  %s507_s9 = sphi %s534_s9, %s596_s9  }
   0x3   : > { %p33_p1 = scmp.ge.s32.totalorder %s31_s12, 2  ;;  %p152_p2 = scmp.lt.s32.totalorder %s515_s11, 3 }
   0x5   : > { %s599_s12 = smov (%p33_p1, %s31_s12), 0  ;;  %p153_p3 = pnand %p452_p0, %p152_p2 }
   0x6   : > { %p184_p4 = scmp.lt.s32.totalorder (!%p153_p3), %s507_s9, 1 }
   0x7   : > { %156 = sbr.rel (%p153_p3) target bundleno = 475 (0x1db), region = 28 }
   0xc   : > { %s601_s9 = smov (!%p184_p4, %s507_s9), 1  ;;  %vm223_vm0 = vcmask 64512   ;;  %v517_v4 = vmov inf   ;;  %v259_v5 = vlaneseq  ;;  %vm215_vm2 = vcmask 7168  }
   0xd   : > { %s454_s13 = sshll.u32 %s601_s9, 3  ;;  %s462_s14 = smul.u32 24, %s601_s9  ;;  %211 = vst [vmem:[#allocation3] sm:$0x1] %v517_v4  ;;  %vm353_vm4 = vcmask 1040384   ;;  %vm209_vm5 = vcmask 0  }
   0xe   : > { %s199_s17 = scalar_lea.vmem %s594_s1, %s454_s13  ;;  %v272_v6 = vand.u32 127, %v259_v5  ;;  %v260_v7 = vshrl.u32 %v259_v5, 7  ;;  %216 = vst.msk [vmem:[#allocation2] sm:$0xff] %vm215_vm2, %v517_v4  ;;  %s202_s23 = scalar_lea.vmem %s595_s2, %s601_s9  ;;  %v518_v47 = vmov 0.0  }
   0xf   : > { %v222_v0 = vld [vmem:[%s199_s17] sm:$0xff]  ;;  %s191_s20 = scalar_lea.vmem %s593_s0, %s462_s14  ;;  %217 = vst.msk [vmem:[#allocation2 + $0x8] sm:$0xff] %vm215_vm2, %v517_v4 }
  0x10   : > { %248 = vmatpush.msra.mxu0 %v222_v0  ;;  %460 = vmatpush.msra.mxu1 %v222_v0  ;;  %v219_v1 = vld [vmem:[%s191_s20] sm:$0xff]  ;;  %v220_v2 = vld [vmem:[%s191_s20 + $0x8] sm:$0xff]  ;;  %v221_v3 = vld [vmem:[%s191_s20 + $0x10] sm:$0xff]  ;;  %vm276_vm1 = vcmp.lt.s32.totalorder %v272_v6, 30  ;;  %v262_v10 = vadd.s32 16, %v260_v7  ;;  %218 = vst.msk [vmem:[#allocation2 + $0x10] sm:$0xff] %vm215_vm2, %v517_v4 }
  0x11   : > { %461 = vmatpush.msra.mxu2 %v222_v0  ;;  %455 = vmatmul.msk.f32.vlgmr.msra.gmra.mxu0 %vm223_vm0, %v219_v1  ;;  %210 = vst.msk [vmem:[%s202_s23] sm:$0x1] %vm209_vm5, %v518_v47 }
  0x12   : > { %456 = vmatmul.msk.f32.vlgmr.msra.gmra.mxu1 %vm223_vm0, %v220_v2  ;;  %457 = vmatmul.msk.f32.vlgmr.msra.gmra.mxu2 %vm223_vm0, %v221_v3  ;;  %vm270_vm3 = vcmp.lt.s32.totalorder %v262_v10, 20 }
  0x14   : > { %v316_v23 = vld [vmem:[#allocation3] sm:$0x1] }
  0x15   : > { %v288_v29 = vld [vmem:[#allocation2] sm:$0xff] }
  0x16   : > { %v289_v33 = vld [vmem:[#allocation2 + $0x8] sm:$0xff] }
  0x17   : > { %v290_v32 = vld [vmem:[#allocation2 + $0x10] sm:$0xff] }
  0x18   : > { %v328_v62 = vld [vmem:[%s202_s23] sm:$0x1] }
  0x8e   : > { %v250_v8 = vpop.f32.mrf.mxu0 }
  0x8f   : > { %v279_v9 = vsel %vm276_vm1, %v250_v8, inf  ;;  %v253_v11 = vpop.f32.mrf.mxu1 }
  0x90   : > { %282 = vmin.xlane.f32.xlu0 %v279_v9  ;;  %v307_v12 = vmin.f32 %v250_v8, %v253_v11  ;;  %v280_v14 = vsel %vm276_vm1, %v253_v11, inf }
  0x95   : > { %v256_v13 = vpop.f32.mrf.mxu2 }
  0x96   : > { %v306_v15 = vsel %vm270_vm3, %v256_v13, inf  ;;  %v281_v16 = vsel %vm276_vm1, %v256_v13, inf }
  0x97   : > { %v308_v17 = vmin.f32 %v307_v12, %v306_v15  ;;  %286 = vmin.xlane.f32.xlu1 %v281_v16 }
  0x98   : > { %284 = vmin.xlane.f32.xlu0 %v280_v14 }
  0x99   : > { %v309_v18 = vrot.slane %v308_v17, 4 }
  0x9b   : > { %v310_v19 = vmin.f32 %v308_v17, %v309_v18 }
  0x9d   : > { %v311_v20 = vrot.slane %v310_v19, 2 }
  0x9f   : > { %v312_v21 = vmin.f32 %v310_v19, %v311_v20 }
  0xa1   : > { %v313_v22 = vrot.slane %v312_v21, 1 }
  0xa3   : > { %v314_v24 = vmin.f32 %v312_v21, %v313_v22 }
  0xa5   : > { %v317_v25 = vmin.f32 %v316_v23, %v314_v24 }
  0xa7   : > { %318 = vst [vmem:[#allocation3] sm:$0x1] %v317_v25 }
  0xae   : > { %v349_v26 = vld [vmem:[#allocation3] sm:$0x1] }
  0xaf   : > { %v351_v27 = vsel %vm276_vm1, %v349_v26, 0.0 }
  0xb0   : > { %v354_v28 = vsel %vm353_vm4, %v351_v27, 0.0 }
  0xb1   : > { %355 = vadd.xlane.f32.xlu2 %v354_v28 }
 0x103   : > { %v283_v30 = vpop.xlane.xlu0 %282 }
 0x104   : > { %v291_v31 = vmin.f32 %v288_v29, %v283_v30 }
 0x106   : > { %295 = vst.msk [vmem:[#allocation2] sm:$0xff] %vm215_vm2, %v291_v31 }
 0x10a   : > { %v287_v34 = vpop.xlane.xlu1 %286 }
 0x10b   : > { %v285_v35 = vpop.xlane.xlu0 %284  ;;  %v293_v36 = vmin.f32 %v290_v32, %v287_v34 }
 0x10c   : > { %v292_v37 = vmin.f32 %v289_v33, %v285_v35 }
 0x10d   : > { %297 = vst.msk [vmem:[#allocation2 + $0x10] sm:$0xff] %vm215_vm2, %v293_v36  ;;  %v322_v38 = vld [vmem:[#allocation2] sm:$0xff] }
 0x10e   : > { %296 = vst.msk [vmem:[#allocation2 + $0x8] sm:$0xff] %vm215_vm2, %v292_v37  ;;  %v329_v42 = vsel %vm215_vm2, %v322_v38, 0.0 }
 0x114   : > { %v324_v39 = vld [vmem:[#allocation2 + $0x10] sm:$0xff] }
 0x115   : > { %v323_v40 = vld [vmem:[#allocation2 + $0x8] sm:$0xff]  ;;  %v327_v41 = vsel %vm270_vm3, %v324_v39, 0.0 }
 0x116   : > { %v330_v43 = vsel %vm215_vm2, %v323_v40, 0.0  ;;  %v332_v44 = vsel %vm215_vm2, %v327_v41, 0.0 }
 0x117   : > { %v331_v45 = vadd.f32 %v330_v43, %v329_v42 }
 0x119   : > { %v333_v46 = vadd.f32 %v332_v44, %v331_v45 }
 0x11b   : > { %334 = vadd.xlane.f32.xlu1 %v333_v46 }
 0x124   : > { %v356_v48 = vpop.xlane.xlu2 %355 }
 0x125   : > { %v357_v49 = vrot.slane %v356_v48, 4 }
 0x127   : > { %v358_v50 = vadd.f32 %v357_v49, %v356_v48 }
 0x129   : > { %v359_v51 = vrot.slane %v358_v50, 2 }
 0x12b   : > { %v360_v55 = vadd.f32 %v359_v51, %v358_v50 }
 0x12d   : > { %v361_v58 = vrot.slane %v360_v55, 1 }
 0x12f   : > { %v362_v61 = vadd.f32 %v361_v58, %v360_v55 }
 0x18e   : > { %v335_v52 = vpop.xlane.xlu1 %334 }
 0x18f   : > { %v336_v53 = vrot.slane %v335_v52, 4 }
 0x191   : > { %v337_v54 = vadd.f32 %v336_v53, %v335_v52 }
 0x193   : > { %v338_v56 = vrot.slane %v337_v54, 2 }
 0x195   : > { %v339_v57 = vadd.f32 %v338_v56, %v337_v54 }
 0x197   : > { %v340_v59 = vrot.slane %v339_v57, 1 }
 0x199   : > { %v341_v60 = vadd.f32 %v340_v59, %v339_v57 }
 0x19b   : > { %463 = vpush %v341_v60 }
 0x19c   : > { %465 = vpush %v362_v61 }
 0x1cc   : > { %s464_s24 = spop %463 }
 0x1cd   : > { %v343_v63 = vstv %s464_s24  ;;  %s466_s25 = spop %465 }
 0x1ce   : > { %v344_v0 = vadd.f32 %v343_v63, %v328_v62  ;;  %v364_v2 = vstv %s466_s25 }
 0x1d0   : > { %346 = vst.msk [vmem:[%s202_s23] sm:$0x1] %vm209_vm5, %v344_v0 }
 0x1d7   : > { %v352_v1 = vld [vmem:[%s202_s23] sm:$0x1] }
 0x1d8   : > { %v365_v3 = vadd.f32 %v364_v2, %v352_v1 }
 0x1da   : > { %367 = vst.msk [vmem:[%s202_s23] sm:$0x1] %vm209_vm5, %v365_v3 }
 0x1db PF: > { %s12_s11 = sadd.s32 1, %s515_s11   ;;  %s596_s9 = smov %s511_s10 }
 0x1dc   : > { %p9_p5 = scmp.ge.s32.totalorder %s12_s11, 4   ;;  %s597_s10 = smov %s599_s12 }
 0x1de   :  { %11 = sbr.rel (!%p9_p5) target bundleno = 2 (0x2), region = 78 }

</bundles_post_ra>
